<compile_context>
chip_gen: v5e
topology: v5e:2x2
jax: 0.10.0
libtpu: 0.0.40
codegen_flags: <defaults>
</compile_context>

<pallas_src>
import jax
import jax.numpy as jnp
import numpy as np
from jax.experimental import pallas as pl
from jax.experimental.pallas import tpu as pltpu


def _round_up(x, m):
    return ((x + m - 1) // m) * m


# ---------------------------------------------------------------------------
# Kernel: fused Local_agg + Global_agg on one lane-tile of the params.
#
#   w_ref      : SMEM [C, C]  normalized Local_agg weights:
#                             (importance-masked neighbors + self) / (m + 1)
#   params_ref : VMEM [C, td] lane-tile of the flattened client parameters
#   local_ref  : VMEM [C, td] Local_agg output tile (row i = client i)
#   global_ref : VMEM [1, td] Global_agg output tile (uniform mean)
# ---------------------------------------------------------------------------
def fused_agg_kernel(w_ref, params_ref, local_ref, global_ref):
    c = params_ref.shape[0]

    # Load each client's row exactly once (C is tiny and static -> fully unrolled).
    rows = [params_ref[pl.ds(j, 1), :] for j in range(c)]  # each (1, td)

    # Global_agg: uniform mean over clients (exact f32 VPU adds).
    g = rows[0]
    for j in range(1, c):
        g = g + rows[j]
    global_ref[...] = g * (1.0 / c)

    # Local_agg: importance-masked neighbor average per client.
    # Scalar weights come from SMEM; accumulation stays on the VPU in f32.
    for i in range(c):
        acc = w_ref[i, 0] * rows[0]
        for j in range(1, c):
            acc = acc + w_ref[i, j] * rows[j]
        local_ref[pl.ds(i, 1), :] = acc


# ---------------------------------------------------------------------------
# Wrappers
# ---------------------------------------------------------------------------
def build_local_weights(imp):
    """Normalized Local_agg weights, computed once in plain JAX.

    PyTorch Local_agg semantics (per client i):
        P_new[i] = (P[i] + sum_{j != i, Imp[i,j] > 0} P[j]) / (m + 1)
    """
    c = imp.shape[0]
    eye = jnp.eye(c, dtype=jnp.float32)
    neighbor = jnp.where(jnp.logical_and(imp > 0.0, eye == 0.0), 1.0, 0.0)
    w = neighbor + eye                                # include self
    counts = jnp.sum(w, axis=1, keepdims=True)        # (m + 1) per client
    return (w / counts).astype(jnp.float32)           # [C, C]


def choose_lane_tile(d_raw, td_max=131072):
    """Pick the lane tile: one block for small D, td_max-lane tiles for large D."""
    td = min(td_max, _round_up(max(d_raw, 1), 128))
    d_pad = _round_up(max(d_raw, 1), td)
    return td, d_pad


def fused_agg(imp, params, *, td=None, td_max=131072):
    """Fused Local_agg + Global_agg.

    imp:    [C, C] float32 importance matrix.
    params: [C, D] float32 flattened client parameters, D % td == 0.
    Returns (p_local [C, D], p_global [1, D]).  Note D is the padded length;
    callers must slice back to the raw parameter count before unflattening.
    """
    c, d = params.shape
    if td is None:
        td, d_need = choose_lane_tile(d, td_max)
        assert d_need == d, "params D must already be padded to a tile multiple"
    assert td % 128 == 0 and d % td == 0, "D must be a multiple of td (mult of 128)"

    w = build_local_weights(imp)                      # [C, C] in SMEM

    # VMEM budget: sublane-padded tiles (C<8 pads to 8), double-buffered.
    pad8 = lambda n: _round_up(max(n, 1), 8)
    tile_bytes = (pad8(c) + pad8(c) + pad8(1)) * td * 4
    vmem_limit = int(min(max(2 * tile_bytes + (4 << 20), 16 << 20), 48 << 20))

    grid = (d // td,)
    p_local, p_global = pl.pallas_call(
        fused_agg_kernel,
        out_shape=(jax.ShapeDtypeStruct((c, d), jnp.float32),
                   jax.ShapeDtypeStruct((1, d), jnp.float32)),
        grid_spec=pltpu.PrefetchScalarGridSpec(
            num_scalar_prefetch=0,
            grid=grid,
            in_specs=[
                pl.BlockSpec(memory_space=pltpu.MemorySpace.SMEM),  # weights table
                pl.BlockSpec((c, td), lambda t: (0, t)),            # params lane-tile
            ],
            out_specs=[
                pl.BlockSpec((c, td), lambda t: (0, t)),            # Local_agg
                pl.BlockSpec((1, td), lambda t: (0, t)),            # Global_agg
            ],
        ),
        compiler_params=pltpu.CompilerParams(
            dimension_semantics=("parallel",),
            vmem_limit_bytes=vmem_limit,
        ),
    )(w, params)
    return p_local, p_global


# ---------------------------------------------------------------------------
# Glue: build deterministic "client state_dicts" and flatten them
# ---------------------------------------------------------------------------
def make_client_state_dict(key):
    """A tiny MNISTNet-like parameter set (shapes only matter as a stand-in)."""
    k1, k2, k3, k4 = jax.random.split(key, 4)
    return {
        "conv1.weight": jax.random.normal(k1, (8, 1, 3, 3), jnp.float32) * 0.1,
        "conv1.bias": jax.random.normal(k2, (8,), jnp.float32) * 0.1,
        "fc.weight": jax.random.normal(k3, (10, 8 * 7 * 7), jnp.float32) * 0.05,
        "fc.bias": jax.random.normal(k4, (10,), jnp.float32) * 0.05,
    }


def flatten_and_pad(state_dicts, d_pad):
    """Flatten each client's state_dict and zero-pad D up to d_pad lanes."""
    flats = [jnp.concatenate([v.reshape(-1) for v in sd.values()])
             for sd in state_dicts]
    stacked = jnp.stack(flats)                        # [C, D_raw]
    d_raw = stacked.shape[1]
    return jnp.pad(stacked, ((0, 0), (0, d_pad - d_raw))), d_raw


# TODO(synk): the remainder of cnn.forward (per-client SGD training of
# MobileNet/MNISTNet, GATLayer.update_graph/forward, CrossEntropy eval,
# multiprocessing, CSV dumping) relies on classes and I/O not defined in the
# provided source and has no Pallas equivalent; only the state-dict
# aggregation math (Local_agg / Global_agg) is implemented here.


if __name__ == "__main__":
    CLIENTS = 4

    key = jax.random.PRNGKey(0)
    keys = jax.random.split(key, CLIENTS + 1)

    # Deterministic per-client "model parameters".
    state_dicts = [make_client_state_dict(keys[i]) for i in range(CLIENTS)]
    d_raw = int(sum(int(np.prod(v.shape)) for v in state_dicts[0].values()))
    td, d_pad = choose_lane_tile(d_raw)               # demo: single 4096-lane tile
    params, _ = flatten_and_pad(state_dicts, d_pad)   # [C, D_pad] float32

    # Deterministic importance matrix (Imp in Local_agg).
    imp = (jax.random.uniform(keys[-1], (CLIENTS, CLIENTS), jnp.float32)
           - 0.4).astype(jnp.float32)

    # Run the fused Pallas kernel (single HBM pass over params, two outputs).
    p_local, p_global = fused_agg(imp, params, td=td)
    p_local, p_global = jax.block_until_ready((p_local, p_global))

    # --- reference check (plain numpy, mirrors the PyTorch loops) -----------
    params_np = np.asarray(params)
    imp_np = np.asarray(imp)
    ref_local = np.empty_like(params_np)
    for i in range(CLIENTS):
        acc = params_np[i].copy()
        m = 0
        for j in range(CLIENTS):
            if i != j and imp_np[i, j] > 0:
                acc = acc + params_np[j]
                m += 1
        ref_local[i] = acc / (m + 1)
    ref_global = params_np.mean(axis=0, keepdims=True)

    np.testing.assert_allclose(np.asarray(p_local), ref_local,
                               rtol=1e-5, atol=1e-6)
    np.testing.assert_allclose(np.asarray(p_global), ref_global,
                               rtol=1e-5, atol=1e-6)

    print("KERNEL_OK")
</pallas_src>

<mosaic_0001>
module attributes {stable_mosaic.version = 11 : i64} {
  func.func @fused_agg_kernel(%arg0: i32, %arg1: memref<4x4xf32, #tpu.memory_space<smem>>, %arg2: memref<4x4096xf32, #tpu.memory_space<vmem>>, %arg3: memref<4x4096xf32, #tpu.memory_space<vmem>>, %arg4: memref<1x4096xf32, #tpu.memory_space<vmem>>) attributes {dimension_semantics = [#tpu.dimension_semantics<parallel>], iteration_bounds = array<i64: 1>, scalar_prefetch = 0 : i64, scratch_operands = 0 : i64, tpu.core_type = #tpu.core_type<tc>, window_params = [{transform_indices = @transform_0, window_bounds = array<i64: 4, 4>}, {transform_indices = @transform_1, window_bounds = array<i64: 4, 4096>}, {transform_indices = @transform_2, window_bounds = array<i64: 4, 4096>}, {transform_indices = @transform_3, window_bounds = array<i64: 1, 4096>}]} {
    %c0 = arith.constant 0 : index
    %c0_0 = arith.constant 0 : index
    %0 = vector.load %arg2[%c0, %c0_0] : memref<4x4096xf32, #tpu.memory_space<vmem>>, vector<1x4096xf32>
    %c1 = arith.constant 1 : index
    %c0_1 = arith.constant 0 : index
    %1 = vector.load %arg2[%c1, %c0_1] : memref<4x4096xf32, #tpu.memory_space<vmem>>, vector<1x4096xf32>
    %c2 = arith.constant 2 : index
    %c0_2 = arith.constant 0 : index
    %2 = vector.load %arg2[%c2, %c0_2] : memref<4x4096xf32, #tpu.memory_space<vmem>>, vector<1x4096xf32>
    %c3 = arith.constant 3 : index
    %c0_3 = arith.constant 0 : index
    %3 = vector.load %arg2[%c3, %c0_3] : memref<4x4096xf32, #tpu.memory_space<vmem>>, vector<1x4096xf32>
    %4 = arith.addf %0, %1 : vector<1x4096xf32>
    %5 = arith.addf %4, %2 : vector<1x4096xf32>
    %6 = arith.addf %5, %3 : vector<1x4096xf32>
    %cst = arith.constant 2.500000e-01 : f32
    %7 = vector.broadcast %cst : f32 to vector<1x4096xf32>
    %8 = arith.mulf %6, %7 : vector<1x4096xf32>
    %c0_4 = arith.constant 0 : index
    %c0_5 = arith.constant 0 : index
    %9 = vector.load %arg4[%c0_4, %c0_5] : memref<1x4096xf32, #tpu.memory_space<vmem>>, vector<1x4096xf32>
    tpu.vector_store %arg4[%c0_4, %c0_5], %8 {strides = array<i32>} : memref<1x4096xf32, #tpu.memory_space<vmem>>, vector<1x4096xf32>,
    %c0_6 = arith.constant 0 : index
    %c0_7 = arith.constant 0 : index
    %10 = memref.load %arg1[%c0_6, %c0_7] : memref<4x4xf32, #tpu.memory_space<smem>>
    %11 = vector.broadcast %10 : f32 to vector<1x4096xf32>
    %12 = arith.mulf %11, %0 : vector<1x4096xf32>
    %c0_8 = arith.constant 0 : index
    %c1_9 = arith.constant 1 : index
    %13 = memref.load %arg1[%c0_8, %c1_9] : memref<4x4xf32, #tpu.memory_space<smem>>
    %14 = vector.broadcast %13 : f32 to vector<1x4096xf32>
    %15 = arith.mulf %14, %1 : vector<1x4096xf32>
    %16 = arith.addf %12, %15 : vector<1x4096xf32>
    %c0_10 = arith.constant 0 : index
    %c2_11 = arith.constant 2 : index
    %17 = memref.load %arg1[%c0_10, %c2_11] : memref<4x4xf32, #tpu.memory_space<smem>>
    %18 = vector.broadcast %17 : f32 to vector<1x4096xf32>
    %19 = arith.mulf %18, %2 : vector<1x4096xf32>
    %20 = arith.addf %16, %19 : vector<1x4096xf32>
    %c0_12 = arith.constant 0 : index
    %c3_13 = arith.constant 3 : index
    %21 = memref.load %arg1[%c0_12, %c3_13] : memref<4x4xf32, #tpu.memory_space<smem>>
    %22 = vector.broadcast %21 : f32 to vector<1x4096xf32>
    %23 = arith.mulf %22, %3 : vector<1x4096xf32>
    %24 = arith.addf %20, %23 : vector<1x4096xf32>
    %c0_14 = arith.constant 0 : index
    %c0_15 = arith.constant 0 : index
    %25 = vector.load %arg3[%c0_14, %c0_15] : memref<4x4096xf32, #tpu.memory_space<vmem>>, vector<1x4096xf32>
    tpu.vector_store %arg3[%c0_14, %c0_15], %24 {strides = array<i32>} : memref<4x4096xf32, #tpu.memory_space<vmem>>, vector<1x4096xf32>,
    %c1_16 = arith.constant 1 : index
    %c0_17 = arith.constant 0 : index
    %26 = memref.load %arg1[%c1_16, %c0_17] : memref<4x4xf32, #tpu.memory_space<smem>>
    %27 = vector.broadcast %26 : f32 to vector<1x4096xf32>
    %28 = arith.mulf %27, %0 : vector<1x4096xf32>
    %c1_18 = arith.constant 1 : index
    %c1_19 = arith.constant 1 : index
    %29 = memref.load %arg1[%c1_18, %c1_19] : memref<4x4xf32, #tpu.memory_space<smem>>
    %30 = vector.broadcast %29 : f32 to vector<1x4096xf32>
    %31 = arith.mulf %30, %1 : vector<1x4096xf32>
    %32 = arith.addf %28, %31 : vector<1x4096xf32>
    %c1_20 = arith.constant 1 : index
    %c2_21 = arith.constant 2 : index
    %33 = memref.load %arg1[%c1_20, %c2_21] : memref<4x4xf32, #tpu.memory_space<smem>>
    %34 = vector.broadcast %33 : f32 to vector<1x4096xf32>
    %35 = arith.mulf %34, %2 : vector<1x4096xf32>
    %36 = arith.addf %32, %35 : vector<1x4096xf32>
    %c1_22 = arith.constant 1 : index
    %c3_23 = arith.constant 3 : index
    %37 = memref.load %arg1[%c1_22, %c3_23] : memref<4x4xf32, #tpu.memory_space<smem>>
    %38 = vector.broadcast %37 : f32 to vector<1x4096xf32>
    %39 = arith.mulf %38, %3 : vector<1x4096xf32>
    %40 = arith.addf %36, %39 : vector<1x4096xf32>
    %c1_24 = arith.constant 1 : index
    %c0_25 = arith.constant 0 : index
    %41 = vector.load %arg3[%c1_24, %c0_25] : memref<4x4096xf32, #tpu.memory_space<vmem>>, vector<1x4096xf32>
    tpu.vector_store %arg3[%c1_24, %c0_25], %40 {strides = array<i32>} : memref<4x4096xf32, #tpu.memory_space<vmem>>, vector<1x4096xf32>,
    %c2_26 = arith.constant 2 : index
    %c0_27 = arith.constant 0 : index
    %42 = memref.load %arg1[%c2_26, %c0_27] : memref<4x4xf32, #tpu.memory_space<smem>>
    %43 = vector.broadcast %42 : f32 to vector<1x4096xf32>
    %44 = arith.mulf %43, %0 : vector<1x4096xf32>
    %c2_28 = arith.constant 2 : index
    %c1_29 = arith.constant 1 : index
    %45 = memref.load %arg1[%c2_28, %c1_29] : memref<4x4xf32, #tpu.memory_space<smem>>
    %46 = vector.broadcast %45 : f32 to vector<1x4096xf32>
    %47 = arith.mulf %46, %1 : vector<1x4096xf32>
    %48 = arith.addf %44, %47 : vector<1x4096xf32>
    %c2_30 = arith.constant 2 : index
    %c2_31 = arith.constant 2 : index
    %49 = memref.load %arg1[%c2_30, %c2_31] : memref<4x4xf32, #tpu.memory_space<smem>>
    %50 = vector.broadcast %49 : f32 to vector<1x4096xf32>
    %51 = arith.mulf %50, %2 : vector<1x4096xf32>
    %52 = arith.addf %48, %51 : vector<1x4096xf32>
    %c2_32 = arith.constant 2 : index
    %c3_33 = arith.constant 3 : index
    %53 = memref.load %arg1[%c2_32, %c3_33] : memref<4x4xf32, #tpu.memory_space<smem>>
    %54 = vector.broadcast %53 : f32 to vector<1x4096xf32>
    %55 = arith.mulf %54, %3 : vector<1x4096xf32>
    %56 = arith.addf %52, %55 : vector<1x4096xf32>
    %c2_34 = arith.constant 2 : index
    %c0_35 = arith.constant 0 : index
    %57 = vector.load %arg3[%c2_34, %c0_35] : memref<4x4096xf32, #tpu.memory_space<vmem>>, vector<1x4096xf32>
    tpu.vector_store %arg3[%c2_34, %c0_35], %56 {strides = array<i32>} : memref<4x4096xf32, #tpu.memory_space<vmem>>, vector<1x4096xf32>,
    %c3_36 = arith.constant 3 : index
    %c0_37 = arith.constant 0 : index
    %58 = memref.load %arg1[%c3_36, %c0_37] : memref<4x4xf32, #tpu.memory_space<smem>>
    %59 = vector.broadcast %58 : f32 to vector<1x4096xf32>
    %60 = arith.mulf %59, %0 : vector<1x4096xf32>
    %c3_38 = arith.constant 3 : index
    %c1_39 = arith.constant 1 : index
    %61 = memref.load %arg1[%c3_38, %c1_39] : memref<4x4xf32, #tpu.memory_space<smem>>
    %62 = vector.broadcast %61 : f32 to vector<1x4096xf32>
    %63 = arith.mulf %62, %1 : vector<1x4096xf32>
    %64 = arith.addf %60, %63 : vector<1x4096xf32>
    %c3_40 = arith.constant 3 : index
    %c2_41 = arith.constant 2 : index
    %65 = memref.load %arg1[%c3_40, %c2_41] : memref<4x4xf32, #tpu.memory_space<smem>>
    %66 = vector.broadcast %65 : f32 to vector<1x4096xf32>
    %67 = arith.mulf %66, %2 : vector<1x4096xf32>
    %68 = arith.addf %64, %67 : vector<1x4096xf32>
    %c3_42 = arith.constant 3 : index
    %c3_43 = arith.constant 3 : index
    %69 = memref.load %arg1[%c3_42, %c3_43] : memref<4x4xf32, #tpu.memory_space<smem>>
    %70 = vector.broadcast %69 : f32 to vector<1x4096xf32>
    %71 = arith.mulf %70, %3 : vector<1x4096xf32>
    %72 = arith.addf %68, %71 : vector<1x4096xf32>
    %c3_44 = arith.constant 3 : index
    %c0_45 = arith.constant 0 : index
    %73 = vector.load %arg3[%c3_44, %c0_45] : memref<4x4096xf32, #tpu.memory_space<vmem>>, vector<1x4096xf32>
    tpu.vector_store %arg3[%c3_44, %c0_45], %72 {strides = array<i32>} : memref<4x4096xf32, #tpu.memory_space<vmem>>, vector<1x4096xf32>,
    return
  }
  func.func @transform_0(%arg0: i32) -> (i32, i32) {
    %c0_i32 = arith.constant 0 : i32
    %c0_i32_0 = arith.constant 0 : i32
    %c0_i32_1 = arith.constant 0 : i32
    return %c0_i32, %c0_i32_0 : i32, i32
  }
  func.func @transform_1(%arg0: i32) -> (i32, i32) {
    %c0_i32 = arith.constant 0 : i32
    %c0_i32_0 = arith.constant 0 : i32
    return %c0_i32, %arg0 : i32, i32
  }
  func.func @transform_2(%arg0: i32) -> (i32, i32) {
    %c0_i32 = arith.constant 0 : i32
    %c0_i32_0 = arith.constant 0 : i32
    return %c0_i32, %arg0 : i32, i32
  }
  func.func @transform_3(%arg0: i32) -> (i32, i32) {
    %c0_i32 = arith.constant 0 : i32
    %c0_i32_0 = arith.constant 0 : i32
    return %c0_i32, %arg0 : i32, i32
  }
}

</mosaic_0001>

<bundles_post_ra>
// kernel: tpu_custom_call.1
= control target key start
LH: loop header
LB: loop body
LE: loop exit
PB: predicated region body
PF: predicated region fallthrough
CT: control target
= control target key end

     0   :  { %9 = vsyncpa [#allocation5], 0  ;;  %s600_s0 = inlined_call_operand.hbm [shape: f32[4,4], index: 0, kind: input, shape index: {}]   ;;  %s601_s1 = inlined_call_operand.hbm [shape: f32[4,4096], index: 1, kind: input, shape index: {}]   ;;  %s602_s2 = inlined_call_operand.hbm [shape: f32[4,4096], index: 2, kind: output, shape index: {0}]   ;;  %s603_s3 = inlined_call_operand.hbm [shape: f32[1,4096], index: 3, kind: output, shape index: {1}]  }
   0x1   :  { %10 = vsyncpa [#allocation3], 0 }
   0x2   :  { %11 = vsyncpa [#allocation4], 0 }
   0x3   :  { %12 = vsyncpa [#allocation9], 0  ;;  %s18_s14 = sshll.u32 %s600_s0, 4  ;;  %s27_s17 = sshll.u32 %s601_s1, 4  ;;  %s19_s14 = int_to_ptr.hbm [resolvable:$true] %s18_s14  ;;  %s28_s17 = int_to_ptr.hbm [resolvable:$true] %s27_s17 }
   0x4   :  { %s413_s18 = smov [#allocation2]   ;;  %s414_s19 = smov [#allocation6]  }
   0x5   :  { %21 = dma.hbm_to_smem %s19_s14, 64, %s413_s18, [#allocation5]  }
   0x6   :  { %s29_s20 = sshll.u32 %s414_s19, 4  ;;  %s30_s20 = int_to_ptr.vmem [resolvable:$true] %s29_s20 }
   0x7   :  { %32 = dma.hbm_to_vmem [thread:$0]  %s28_s17, 2048, %s30_s20, [#allocation3]  }
   0x8   :  { %405 = dma.done.wait [#allocation5], 64  }
   0x9   :  { %406 = vsyncadd [#allocation5], 4294967232 }
   0xa   :  { %407 = dma.done.wait [#allocation3], 2048  }
   0xb   :  { %408 = vsyncadd [#allocation3], 4294965248 }
   0xc   :  { %41 = sfence }
   0xd   :  { %v443_v0 = vld [vmem:[#allocation6] ss:$4 sm:$0xff]  ;;  %v445_v1 = vld [vmem:[#allocation6 + $0x1] ss:$4 sm:$0xff]  ;;  %v447_v2 = vld [vmem:[#allocation6 + $0x2] ss:$4 sm:$0xff] }
   0xe   :  { %v73_v3 = vadd.f32 %v445_v1, %v443_v0  ;;  %v451_v4 = vld [vmem:[#allocation6 + $0x20] ss:$4 sm:$0xff]  ;;  %v453_v5 = vld [vmem:[#allocation6 + $0x21] ss:$4 sm:$0xff]  ;;  %v455_v6 = vld [vmem:[#allocation6 + $0x3] ss:$4 sm:$0xff] }
   0xf   :  { %v457_v7 = vld [vmem:[#allocation6 + $0x22] ss:$4 sm:$0xff]  ;;  %v74_v8 = vadd.f32 %v453_v5, %v451_v4  ;;  %v461_v9 = vld [vmem:[#allocation6 + $0x40] ss:$4 sm:$0xff]  ;;  %v464_v11 = vld [vmem:[#allocation6 + $0x23] ss:$4 sm:$0xff] }
  0x10   :  { %v77_v10 = vadd.f32 %v73_v3, %v447_v2  ;;  %v466_v12 = vld [vmem:[#allocation6 + $0x41] ss:$4 sm:$0xff]  ;;  %v468_v13 = vld [vmem:[#allocation6 + $0x42] ss:$4 sm:$0xff]  ;;  %v473_v16 = vld [vmem:[#allocation6 + $0x60] ss:$4 sm:$0xff] }
  0x11   :  { %v78_v14 = vadd.f32 %v74_v8, %v457_v7  ;;  %v75_v15 = vadd.f32 %v466_v12, %v461_v9  ;;  %v475_v17 = vld [vmem:[#allocation6 + $0x61] ss:$4 sm:$0xff]  ;;  %v477_v18 = vld [vmem:[#allocation6 + $0x62] ss:$4 sm:$0xff]  ;;  %v480_v20 = vld [vmem:[#allocation6 + $0x43] ss:$4 sm:$0xff] }
  0x12   :  { %v81_v19 = vadd.f32 %v77_v10, %v455_v6  ;;  %v76_v21 = vadd.f32 %v475_v17, %v473_v16  ;;  %s93_s0 = sld [smem:[#allocation2]]  ;;  %v486_v24 = vld [vmem:[#allocation6 + $0x63] ss:$4 sm:$0xff]  ;;  %s415_s27 = smov [#allocation8]  }
  0x13   :  { %v82_v22 = vadd.f32 %v78_v14, %v464_v11  ;;  %v79_v23 = vadd.f32 %v75_v15, %v468_v13  ;;  %s302_s1 = sld [smem:[#allocation2 + $0x1]]  ;;  %s508_s28 = sshll.u32 %s415_s27, 4  ;;  %s285_s28 = int_to_ptr.vmem [resolvable:$true] %s508_s28 }
  0x14   :  { %v85_v25 = vmul.f32 0.25, %v81_v19  ;;  %v80_v26 = vadd.f32 %v76_v21, %v477_v18  ;;  %s303_s21 = sld [smem:[#allocation2 + $0x2]]  ;;  %s286_s4 = sshll.u32 %s603_s3, 4  ;;  %s287_s4 = int_to_ptr.hbm [resolvable:$true] %s286_s4 }
  0x15   :  { %v86_v27 = vmul.f32 0.25, %v82_v22  ;;  %v83_v28 = vadd.f32 %v79_v23, %v480_v20  ;;  %s304_s22 = sld [smem:[#allocation2 + $0x3]]  ;;  %s416_s12 = smov [#allocation7]  }
  0x16   :  { %89 = vst [vmem:[#allocation8] sm:$0xff] %v85_v25  ;;  %v84_v29 = vadd.f32 %v80_v26, %v486_v24  ;;  %s491_s23 = sld [smem:[#allocation2 + $0x80]]  ;;  %s273_s13 = sshll.u32 %s416_s12, 4  ;;  %s274_s13 = int_to_ptr.vmem [resolvable:$true] %s273_s13 }
  0x17   :  { %90 = vst [vmem:[#allocation8 + $0x8] sm:$0xff] %v86_v27  ;;  %v87_v30 = vmul.f32 0.25, %v83_v28  ;;  %s493_s24 = sld [smem:[#allocation2 + $0x81]]  ;;  %s275_s16 = sshll.u32 %s602_s2, 4  ;;  %s276_s16 = int_to_ptr.hbm [resolvable:$true] %s275_s16 }
  0x18   :  { %v88_v31 = vmul.f32 0.25, %v84_v29  ;;  %v94_v32 = vstv %s93_s0  ;;  %s495_s25 = sld [smem:[#allocation2 + $0x82]] }
  0x19   :  { %91 = vst [vmem:[#allocation8 + $0x10] sm:$0xff] %v87_v30  ;;  %v95_v33 = vmul.f32 %v94_v32, %v443_v0  ;;  %v100_v34 = vstv %s302_s1  ;;  %v96_v35 = vmul.f32 %v94_v32, %v451_v4  ;;  %v97_v36 = vmul.f32 %v94_v32, %v461_v9  ;;  %s500_s26 = sld [smem:[#allocation2 + $0x83]] }
  0x1a   :  { %92 = vst [vmem:[#allocation8 + $0x18] sm:$0xff] %v88_v31  ;;  %v101_v37 = vmul.f32 %v100_v34, %v445_v1  ;;  %v110_v38 = vstv %s303_s21  ;;  %v102_v39 = vmul.f32 %v100_v34, %v453_v5  ;;  %v103_v40 = vmul.f32 %v100_v34, %v466_v12  ;;  %s520_s5 = sld [smem:[#allocation2 + $0x100]] }
  0x1b   :  { %v111_v41 = vmul.f32 %v110_v38, %v447_v2  ;;  %v120_v42 = vstv %s304_s22  ;;  %v112_v43 = vmul.f32 %v110_v38, %v457_v7  ;;  %v113_v44 = vmul.f32 %v110_v38, %v468_v13  ;;  %s525_s3 = sld [smem:[#allocation2 + $0x101]] }
  0x1c   :  { %v105_v45 = vadd.f32 %v101_v37, %v95_v33  ;;  %v121_v46 = vmul.f32 %v120_v42, %v455_v6  ;;  %v106_v47 = vadd.f32 %v102_v39, %v96_v35  ;;  %v122_v48 = vmul.f32 %v120_v42, %v464_v11  ;;  %s529_s6 = sld [smem:[#allocation2 + $0x102]] }
  0x1d   :  { %v107_v49 = vadd.f32 %v103_v40, %v97_v36  ;;  %v123_v50 = vmul.f32 %v120_v42, %v480_v20  ;;  %v98_v51 = vmul.f32 %v94_v32, %v473_v16  ;;  %v104_v52 = vmul.f32 %v100_v34, %v475_v17  ;;  %s533_s7 = sld [smem:[#allocation2 + $0x103]] }
  0x1e   :  { %v115_v53 = vadd.f32 %v111_v41, %v105_v45  ;;  %v116_v54 = vadd.f32 %v112_v43, %v106_v47  ;;  %v114_v55 = vmul.f32 %v110_v38, %v477_v18  ;;  %v124_v56 = vmul.f32 %v120_v42, %v486_v24  ;;  %289 = dma.vmem_to_hbm [thread:$0]  %s285_s28, 512, %s287_s4, [#allocation9]  }
  0x1f   :  { %v117_v57 = vadd.f32 %v113_v44, %v107_v49  ;;  %v108_v58 = vadd.f32 %v104_v52, %v98_v51  ;;  %v137_v59 = vstv %s491_s23  ;;  %v143_v60 = vstv %s493_s24  ;;  %s549_s8 = sld [smem:[#allocation2 + $0x180]] }
  0x20   :  { %v125_v61 = vadd.f32 %v121_v46, %v115_v53  ;;  %v126_v62 = vadd.f32 %v122_v48, %v116_v54  ;;  %v138_v63 = vmul.f32 %v137_v59, %v443_v0  ;;  %v144_v3 = vmul.f32 %v143_v60, %v445_v1  ;;  %s553_s9 = sld [smem:[#allocation2 + $0x181]] }
  0x21   :  { %v127_v8 = vadd.f32 %v123_v50, %v117_v57  ;;  %v118_v10 = vadd.f32 %v114_v55, %v108_v58  ;;  %v153_v14 = vstv %s495_s25  ;;  %v163_v15 = vstv %s500_s26  ;;  %s558_s10 = sld [smem:[#allocation2 + $0x182]] }
  0x22   :  { %129 = vst [vmem:[#allocation7] ss:$4 sm:$0xff] %v125_v61  ;;  %v148_v19 = vadd.f32 %v144_v3, %v138_v63  ;;  %v154_v21 = vmul.f32 %v153_v14, %v447_v2  ;;  %v164_v22 = vmul.f32 %v163_v15, %v455_v6  ;;  %v139_v23 = vmul.f32 %v137_v59, %v451_v4  ;;  %s562_s11 = sld [smem:[#allocation2 + $0x183]] }
  0x23   :  { %131 = vst [vmem:[#allocation7 + $0x20] ss:$4 sm:$0xff] %v126_v62  ;;  %v128_v25 = vadd.f32 %v124_v56, %v118_v10  ;;  %v145_v26 = vmul.f32 %v143_v60, %v453_v5  ;;  %v155_v27 = vmul.f32 %v153_v14, %v457_v7  ;;  %v165_v28 = vmul.f32 %v163_v15, %v464_v11 }
  0x24   :  { %133 = vst [vmem:[#allocation7 + $0x40] ss:$4 sm:$0xff] %v127_v8  ;;  %v158_v29 = vadd.f32 %v154_v21, %v148_v19  ;;  %v140_v30 = vmul.f32 %v137_v59, %v461_v9  ;;  %v146_v31 = vmul.f32 %v143_v60, %v466_v12  ;;  %v156_v32 = vmul.f32 %v153_v14, %v468_v13 }
  0x25   :  { %135 = vst [vmem:[#allocation7 + $0x60] ss:$4 sm:$0xff] %v128_v25  ;;  %v149_v33 = vadd.f32 %v145_v26, %v139_v23  ;;  %v166_v34 = vmul.f32 %v163_v15, %v480_v20  ;;  %v141_v35 = vmul.f32 %v137_v59, %v473_v16  ;;  %v147_v36 = vmul.f32 %v143_v60, %v475_v17 }
  0x26   :  { %v168_v37 = vadd.f32 %v164_v22, %v158_v29  ;;  %v150_v38 = vadd.f32 %v146_v31, %v140_v30  ;;  %v157_v39 = vmul.f32 %v153_v14, %v477_v18  ;;  %v167_v40 = vmul.f32 %v163_v15, %v486_v24 }
  0x27   :  { %v159_v41 = vadd.f32 %v155_v27, %v149_v33  ;;  %v151_v42 = vadd.f32 %v147_v36, %v141_v35  ;;  %v181_v43 = vstv %s520_s5  ;;  %v187_v44 = vstv %s525_s3 }
  0x28   :  { %173 = vst [vmem:[#allocation7 + $0x1] ss:$4 sm:$0xff] %v168_v37  ;;  %v160_v45 = vadd.f32 %v156_v32, %v150_v38  ;;  %v182_v46 = vmul.f32 %v181_v43, %v443_v0  ;;  %v188_v47 = vmul.f32 %v187_v44, %v445_v1  ;;  %v197_v48 = vstv %s529_s6 }
  0x29   :  { %v169_v49 = vadd.f32 %v165_v28, %v159_v41  ;;  %v161_v50 = vadd.f32 %v157_v39, %v151_v42  ;;  %v198_v51 = vmul.f32 %v197_v48, %v447_v2  ;;  %v207_v52 = vstv %s533_s7 }
  0x2a   :  { %v170_v53 = vadd.f32 %v166_v34, %v160_v45  ;;  %v192_v54 = vadd.f32 %v188_v47, %v182_v46  ;;  %v208_v55 = vmul.f32 %v207_v52, %v455_v6  ;;  %v183_v56 = vmul.f32 %v181_v43, %v451_v4 }
  0x2b   :  { %175 = vst [vmem:[#allocation7 + $0x21] ss:$4 sm:$0xff] %v169_v49  ;;  %v171_v57 = vadd.f32 %v167_v40, %v161_v50  ;;  %v189_v58 = vmul.f32 %v187_v44, %v453_v5  ;;  %v199_v59 = vmul.f32 %v197_v48, %v457_v7  ;;  %v209_v60 = vmul.f32 %v207_v52, %v464_v11 }
  0x2c   :  { %177 = vst [vmem:[#allocation7 + $0x41] ss:$4 sm:$0xff] %v170_v53  ;;  %v202_v61 = vadd.f32 %v198_v51, %v192_v54  ;;  %v184_v62 = vmul.f32 %v181_v43, %v461_v9  ;;  %v190_v63 = vmul.f32 %v187_v44, %v466_v12  ;;  %v200_v3 = vmul.f32 %v197_v48, %v468_v13 }
  0x2d   :  { %179 = vst [vmem:[#allocation7 + $0x61] ss:$4 sm:$0xff] %v171_v57  ;;  %v193_v8 = vadd.f32 %v189_v58, %v183_v56  ;;  %v210_v10 = vmul.f32 %v207_v52, %v480_v20  ;;  %v185_v14 = vmul.f32 %v181_v43, %v473_v16  ;;  %v191_v15 = vmul.f32 %v187_v44, %v475_v17 }
  0x2e   :  { %v212_v19 = vadd.f32 %v208_v55, %v202_v61  ;;  %v194_v21 = vadd.f32 %v190_v63, %v184_v62  ;;  %v201_v22 = vmul.f32 %v197_v48, %v477_v18  ;;  %v211_v23 = vmul.f32 %v207_v52, %v486_v24 }
  0x2f   :  { %v203_v25 = vadd.f32 %v199_v59, %v193_v8  ;;  %v195_v26 = vadd.f32 %v191_v15, %v185_v14  ;;  %v225_v27 = vstv %s549_s8  ;;  %v231_v28 = vstv %s553_s9 }
  0x30   :  { %217 = vst [vmem:[#allocation7 + $0x2] ss:$4 sm:$0xff] %v212_v19  ;;  %v204_v29 = vadd.f32 %v200_v3, %v194_v21  ;;  %v226_v30 = vmul.f32 %v225_v27, %v443_v0  ;;  %v232_v31 = vmul.f32 %v231_v28, %v445_v1  ;;  %v241_v32 = vstv %s558_s10 }
  0x31   :  { %v213_v33 = vadd.f32 %v209_v60, %v203_v25  ;;  %v205_v34 = vadd.f32 %v201_v22, %v195_v26  ;;  %v242_v35 = vmul.f32 %v241_v32, %v447_v2  ;;  %v251_v36 = vstv %s562_s11 }
  0x32   :  { %v214_v37 = vadd.f32 %v210_v10, %v204_v29  ;;  %v236_v38 = vadd.f32 %v232_v31, %v226_v30  ;;  %v252_v39 = vmul.f32 %v251_v36, %v455_v6  ;;  %v227_v40 = vmul.f32 %v225_v27, %v451_v4 }
  0x33   :  { %219 = vst [vmem:[#allocation7 + $0x22] ss:$4 sm:$0xff] %v213_v33  ;;  %v215_v41 = vadd.f32 %v211_v23, %v205_v34  ;;  %v233_v42 = vmul.f32 %v231_v28, %v453_v5  ;;  %v243_v0 = vmul.f32 %v241_v32, %v457_v7  ;;  %v228_v43 = vmul.f32 %v225_v27, %v461_v9 }
  0x34   :  { %221 = vst [vmem:[#allocation7 + $0x42] ss:$4 sm:$0xff] %v214_v37  ;;  %v246_v1 = vadd.f32 %v242_v35, %v236_v38  ;;  %v234_v44 = vmul.f32 %v231_v28, %v466_v12  ;;  %v244_v2 = vmul.f32 %v241_v32, %v468_v13  ;;  %v253_v6 = vmul.f32 %v251_v36, %v464_v11 }
  0x35   :  { %223 = vst [vmem:[#allocation7 + $0x62] ss:$4 sm:$0xff] %v215_v41  ;;  %v237_v45 = vadd.f32 %v233_v42, %v227_v40  ;;  %v229_v4 = vmul.f32 %v225_v27, %v473_v16  ;;  %v235_v46 = vmul.f32 %v231_v28, %v475_v17  ;;  %v254_v7 = vmul.f32 %v251_v36, %v480_v20 }
  0x36   :  { %v256_v47 = vadd.f32 %v252_v39, %v246_v1  ;;  %v238_v5 = vadd.f32 %v234_v44, %v228_v43  ;;  %v245_v48 = vmul.f32 %v241_v32, %v477_v18  ;;  %v255_v12 = vmul.f32 %v251_v36, %v486_v24 }
  0x37   :  { %v247_v49 = vadd.f32 %v243_v0, %v237_v45  ;;  %v239_v9 = vadd.f32 %v235_v46, %v229_v4 }
  0x38   :  { %261 = vst [vmem:[#allocation7 + $0x3] ss:$4 sm:$0xff] %v256_v47  ;;  %v248_v13 = vadd.f32 %v244_v2, %v238_v5 }
  0x39   :  { %v257_v11 = vadd.f32 %v253_v6, %v247_v49  ;;  %v249_v16 = vadd.f32 %v245_v48, %v239_v9 }
  0x3a   :  { %v258_v17 = vadd.f32 %v254_v7, %v248_v13 }
  0x3b   :  { %263 = vst [vmem:[#allocation7 + $0x23] ss:$4 sm:$0xff] %v257_v11  ;;  %v259_v50 = vadd.f32 %v255_v12, %v249_v16 }
  0x3c   :  { %265 = vst [vmem:[#allocation7 + $0x43] ss:$4 sm:$0xff] %v258_v17 }
  0x3d   :  { %267 = vst [vmem:[#allocation7 + $0x63] ss:$4 sm:$0xff] %v259_v50 }
  0x3e   :  { %278 = dma.vmem_to_hbm [thread:$0]  %s274_s13, 2048, %s276_s16, [#allocation4]  }
  0x3f   :  { %409 = dma.done.wait [#allocation4], 2048  }
  0x40   :  { %410 = vsyncadd [#allocation4], 4294965248 }
  0x41   :  { %411 = dma.done.wait [#allocation9], 512  }
  0x42   :  { %412 = vsyncadd [#allocation9], 4294966784 }
  0x43   :  { %298 = vsyncpa [#allocation3], 1 }
  0x44   :  { %299 = vsyncpa [#allocation4], 1 }
  0x45   :  { %300 = vsyncpa [#allocation9], 1 }
  0x46   :  { %301 = vsyncpa [#allocation5], 1 }

</bundles_post_ra>
